<compile_context>
chip_gen: v7x
topology: tpu7x:2x2x1
jax: 0.10.0
libtpu: 0.0.40
codegen_flags: <defaults>
</compile_context>

<pallas_src>
import functools

import jax
import jax.numpy as jnp
from jax import lax
from jax.experimental import pallas as pl
from jax.experimental.pallas import tpu as pltpu

EPS = 1e-5                      # nn.BatchNorm2d default
TM = 512                        # rows (pixels) per grid step for the flat 1x1-conv passes
LANE = 128
VMEM_LIMIT = 48 * 1024 * 1024   # conservative: fits v7x (64 MiB physical), generous on v5e/v6e


def _round_up(x, m):
    return (x + m - 1) // m * m


def _cpad(c):
    # Pad channel dims to a multiple of 128 lanes only when already wide; for narrow
    # layers keep the true extent (full-dim last axis is legal) to avoid traffic blow-up.
    return c if c <= LANE else _round_up(c, LANE)


# ---------------------------------------------------------------------------
# Kernel A: [optional fused BN-affine+ReLU of the previous layer] -> 1x1 conv
#           (matmul) -> raw conv output + per-channel sum / sum-of-squares.
# ---------------------------------------------------------------------------
def _mm_stats_kernel(*refs, fuse_input_act, rows_valid, tm):
    if fuse_input_act:
        x_ref, sc_ref, sh_ref, w_ref, y_ref, sum_ref, sumsq_ref = refs
    else:
        x_ref, w_ref, y_ref, sum_ref, sumsq_ref = refs

    @pl.when(pl.program_id(0) == 0)
    def _():
        sum_ref[...] = jnp.zeros_like(sum_ref)
        sumsq_ref[...] = jnp.zeros_like(sumsq_ref)

    a = x_ref[...]
    if fuse_input_act:
        a = jnp.maximum(a * sc_ref[...] + sh_ref[...], 0.0)
        if rows_valid is not None:
            # mask pad rows in-kernel (replaces the old .at[M:].set(0) HBM pass)
            rows = pl.program_id(0) * tm + lax.broadcasted_iota(jnp.int32, a.shape, 0)
            a = jnp.where(rows < rows_valid, a, 0.0)

    acc = jnp.dot(a, w_ref[...], preferred_element_type=jnp.float32)
    y_ref[...] = acc
    sum_ref[...] += jnp.sum(acc, axis=0, keepdims=True)
    sumsq_ref[...] += jnp.sum(acc * acc, axis=0, keepdims=True)


def _conv1x1_stats(x_flat, w_mat, scale=None, shift=None, rows_valid=None):
    Mpad, Kdim = x_flat.shape
    Cout = w_mat.shape[1]
    fuse = scale is not None
    kern = functools.partial(_mm_stats_kernel, fuse_input_act=fuse,
                             rows_valid=rows_valid, tm=TM)
    in_specs = [pl.BlockSpec((TM, Kdim), lambda i: (i, 0))]
    args = [x_flat]
    if fuse:
        row_spec = pl.BlockSpec((1, Kdim), lambda i: (0, 0))
        in_specs += [row_spec, row_spec]
        args += [scale, shift]
    in_specs.append(pl.BlockSpec((Kdim, Cout), lambda i: (0, 0)))
    args.append(w_mat)
    stat_spec = pl.BlockSpec((1, Cout), lambda i: (0, 0))
    return pl.pallas_call(
        kern,
        out_shape=(jax.ShapeDtypeStruct((Mpad, Cout), jnp.float32),
                   jax.ShapeDtypeStruct((1, Cout), jnp.float32),
                   jax.ShapeDtypeStruct((1, Cout), jnp.float32)),
        grid=(Mpad // TM,),
        in_specs=in_specs,
        out_specs=(pl.BlockSpec((TM, Cout), lambda i: (i, 0)), stat_spec, stat_spec),
        compiler_params=pltpu.CompilerParams(
            dimension_semantics=("arbitrary",),      # stats accumulate across M tiles
            vmem_limit_bytes=VMEM_LIMIT),
    )(*args)


# ---------------------------------------------------------------------------
# Kernel B: fused (BN1 affine + ReLU + halo zeroing) -> 3x3 dilated conv with
#           in-kernel im2col (9 per-tap matmuls) -> raw output + stats.
# ---------------------------------------------------------------------------
def _conv3x3_stats_kernel(yp_ref, sc_ref, sh_ref, w_ref, y_ref, sum_ref, sumsq_ref,
                          *, H, W, K, d):
    @pl.when(pl.program_id(0) == 0)
    def _():
        sum_ref[...] = jnp.zeros_like(sum_ref)
        sumsq_ref[...] = jnp.zeros_like(sumsq_ref)

    pad = d * (K // 2)
    yp = yp_ref[0]                                   # (Hp, Wp, C) halo'd raw layer-1 output
    Hp, Wp, C = yp.shape
    Cout = w_ref.shape[-1]

    # fused BN affine + ReLU of the previous layer; zero the conv halo so padded
    # positions behave exactly like the conv's zero padding of the activation.
    a = jnp.maximum(yp * sc_ref[...] + sh_ref[...], 0.0)
    hi = lax.broadcasted_iota(jnp.int32, (Hp, Wp, C), 0)
    wi = lax.broadcasted_iota(jnp.int32, (Hp, Wp, C), 1)
    inside = (hi >= pad) & (hi < pad + H) & (wi >= pad) & (wi < pad + W)
    a = jnp.where(inside, a, 0.0)

    # in-kernel im2col: K*K shifted views of the VMEM-resident tile, one MXU dot per tap.
    acc = jnp.zeros((H * W, Cout), jnp.float32)
    for kh in range(K):
        for kw in range(K):
            tap = a[kh * d:kh * d + H, kw * d:kw * d + W, :].reshape(H * W, C)
            acc = acc + jnp.dot(tap, w_ref[kh * K + kw],
                                preferred_element_type=jnp.float32)

    y_ref[...] = acc
    sum_ref[...] += jnp.sum(acc, axis=0, keepdims=True)
    sumsq_ref[...] += jnp.sum(acc * acc, axis=0, keepdims=True)


def _conv3x3_stats(y1_sp, scale, shift, w_taps, Mpad, H, W, K, d):
    N, Hp, Wp, C = y1_sp.shape
    Cout = w_taps.shape[-1]
    HW = H * W
    kern = functools.partial(_conv3x3_stats_kernel, H=H, W=W, K=K, d=d)
    stat_spec = pl.BlockSpec((1, Cout), lambda n: (0, 0))
    return pl.pallas_call(
        kern,
        out_shape=(jax.ShapeDtypeStruct((Mpad, Cout), jnp.float32),
                   jax.ShapeDtypeStruct((1, Cout), jnp.float32),
                   jax.ShapeDtypeStruct((1, Cout), jnp.float32)),
        grid=(N,),
        in_specs=[pl.BlockSpec((1, Hp, Wp, C), lambda n: (n, 0, 0, 0)),
                  pl.BlockSpec((1, C), lambda n: (0, 0)),
                  pl.BlockSpec((1, C), lambda n: (0, 0)),
                  pl.BlockSpec((K * K, C, Cout), lambda n: (0, 0, 0))],
        out_specs=(pl.BlockSpec((HW, Cout), lambda n: (n, 0)), stat_spec, stat_spec),
        compiler_params=pltpu.CompilerParams(
            dimension_semantics=("arbitrary",),      # stats accumulate across images
            vmem_limit_bytes=VMEM_LIMIT),
    )(y1_sp, scale, shift, w_taps)


# ---------------------------------------------------------------------------
# Kernel C: final BN3 affine + residual add + ReLU (only standalone affine pass).
# ---------------------------------------------------------------------------
def _final_kernel(y_ref, res_ref, sc_ref, sh_ref, out_ref):
    out_ref[...] = jnp.maximum(
        y_ref[...] * sc_ref[...] + sh_ref[...] + res_ref[...], 0.0)


def _final_affine(y, res, scale, shift):
    Mpad, C = y.shape
    tile = pl.BlockSpec((TM, C), lambda i: (i, 0))
    row = pl.BlockSpec((1, C), lambda i: (0, 0))
    return pl.pallas_call(
        _final_kernel,
        out_shape=jax.ShapeDtypeStruct((Mpad, C), jnp.float32),
        grid=(Mpad // TM,),
        in_specs=[tile, tile, row, row],
        out_specs=tile,
        compiler_params=pltpu.CompilerParams(
            dimension_semantics=("parallel",),
            vmem_limit_bytes=VMEM_LIMIT),
    )(y, res, scale, shift)


# ---------------------------------------------------------------------------
# Tiny plain-JAX glue: batch stats -> per-channel scale/shift.
# ---------------------------------------------------------------------------
def _bn_scale_shift(s, ss, gamma, beta, count, cpad):
    # TODO(synk): E[x^2]-E[x]^2 in f32 can cancel for |mean| >> std at huge M.
    mean = s[0] / count
    var = jnp.maximum(ss[0] / count - mean * mean, 0.0)
    inv = lax.rsqrt(var + EPS)
    g = jnp.pad(gamma.astype(jnp.float32), (0, cpad - gamma.shape[0]))
    b = jnp.pad(beta.astype(jnp.float32), (0, cpad - beta.shape[0]))
    scale = g * inv
    shift = b - mean * scale
    return scale[None, :], shift[None, :]


# ---------------------------------------------------------------------------
# Forward of bottleNeckIdentifyPSP (is_batchnorm=True => conv bias=False).
# ---------------------------------------------------------------------------
def bottleneck_identify_psp(x, params, dilation=1):
    w1, g1, b1, w2, g2, b2, w3, g3, b3 = params
    N, Cin, H, W = x.shape
    Cmid = w1.shape[0]
    K = w2.shape[2]
    d = int(dilation)
    pad = d * (K // 2)
    assert w1.shape == (Cmid, Cin, 1, 1)
    assert w2.shape == (Cmid, Cmid, K, K)
    assert w3.shape == (Cin, Cmid, 1, 1)
    # TODO(synk): ragged spatial tiles (H*W not a multiple of 8) would need a 4D y2 layout.
    assert (H * W) % 8 == 0

    Cin_p, Cmid_p = _cpad(Cin), _cpad(Cmid)
    M = N * H * W
    Mpad = _round_up(M, TM)

    # Flat NHWC input, padded once (rows -> Mpad, lanes -> Cin_p); pad rows are zero
    # so they contribute nothing to layer-1 matmul/stats.
    x_flat = jnp.transpose(x, (0, 2, 3, 1)).astype(jnp.float32).reshape(M, Cin)
    x_p = jnp.pad(x_flat, ((0, Mpad - M), (0, Cin_p - Cin)))

    # ---- cbr1: 1x1 conv Cin -> Cmid (+ batch stats); BN affine deferred (fused later)
    w1_mat = jnp.pad(jnp.transpose(w1[:, :, 0, 0], (1, 0)).astype(jnp.float32),
                     ((0, Cin_p - Cin), (0, Cmid_p - Cmid)))
    y1, s1, ss1 = _conv1x1_stats(x_p, w1_mat)
    sc1, sh1 = _bn_scale_shift(s1, ss1, g1, b1, M, Cmid_p)

    # ---- cbr2: fused (BN1 affine + ReLU) -> 3x3 dilated conv, im2col done in-kernel
    y1_sp = jnp.pad(y1[:M].reshape(N, H, W, Cmid_p),
                    ((0, 0), (pad, pad), (pad, pad), (0, 0)))
    w2_taps = jnp.pad(jnp.transpose(w2, (2, 3, 1, 0)).astype(jnp.float32),
                      ((0, 0), (0, 0), (0, Cmid_p - Cmid), (0, Cmid_p - Cmid))
                      ).reshape(K * K, Cmid_p, Cmid_p)
    y2, s2, ss2 = _conv3x3_stats(y1_sp, sc1, sh1, w2_taps, Mpad, H, W, K, d)
    sc2, sh2 = _bn_scale_shift(s2, ss2, g2, b2, M, Cmid_p)

    # ---- cb3: fused (BN2 affine + ReLU + pad-row mask) -> 1x1 conv Cmid -> Cin
    w3_mat = jnp.pad(jnp.transpose(w3[:, :, 0, 0], (1, 0)).astype(jnp.float32),
                     ((0, Cmid_p - Cmid), (0, Cin_p - Cin)))
    y3, s3, ss3 = _conv1x1_stats(y2, w3_mat, scale=sc2, shift=sh2,
                                 rows_valid=(M if Mpad > M else None))
    sc3, sh3 = _bn_scale_shift(s3, ss3, g3, b3, M, Cin_p)

    # ---- final BN3 affine + residual + ReLU
    out_flat = _final_affine(y3, x_p, sc3, sh3)

    out = out_flat[:M, :Cin].reshape(N, H, W, Cin).transpose(0, 3, 1, 2)
    return out.astype(x.dtype)


# ---------------------------------------------------------------------------
# Pure-JAX reference (independent code path via lax.conv_general_dilated).
# ---------------------------------------------------------------------------
def _conv_bn_ref(x, w, gamma, beta, dilation=1, relu=False):
    K = w.shape[2]
    pad = dilation * (K // 2)
    y = lax.conv_general_dilated(
        x, w, window_strides=(1, 1), padding=[(pad, pad), (pad, pad)],
        rhs_dilation=(dilation, dilation),
        dimension_numbers=("NCHW", "OIHW", "NCHW"))
    mean = jnp.mean(y, axis=(0, 2, 3), keepdims=True)
    var = jnp.mean((y - mean) ** 2, axis=(0, 2, 3), keepdims=True)
    y = (y - mean) * lax.rsqrt(var + EPS) * gamma[None, :, None, None] \
        + beta[None, :, None, None]
    return jnp.maximum(y, 0.0) if relu else y


def _reference(x, params, dilation=1):
    w1, g1, b1, w2, g2, b2, w3, g3, b3 = params
    a1 = _conv_bn_ref(x, w1, g1, b1, relu=True)
    a2 = _conv_bn_ref(a1, w2, g2, b2, dilation=dilation, relu=True)
    y3 = _conv_bn_ref(a2, w3, g3, b3)
    return jnp.maximum(y3 + x, 0.0)


if __name__ == "__main__":
    # bottleNeckIdentifyPSP(in_channels=16, mid_channels=4, stride=1, dilation=1)
    N, Cin, H, W = 2, 16, 16, 16
    Cmid, dilation = 4, 1

    key = jax.random.PRNGKey(0)
    ks = jax.random.split(key, 10)
    x = jax.random.normal(ks[0], (N, Cin, H, W), dtype=jnp.float32)
    w1 = 0.1 * jax.random.normal(ks[1], (Cmid, Cin, 1, 1), dtype=jnp.float32)
    w2 = 0.1 * jax.random.normal(ks[2], (Cmid, Cmid, 3, 3), dtype=jnp.float32)
    w3 = 0.1 * jax.random.normal(ks[3], (Cin, Cmid, 1, 1), dtype=jnp.float32)
    g1 = 1.0 + 0.1 * jax.random.normal(ks[4], (Cmid,), dtype=jnp.float32)
    b1 = 0.1 * jax.random.normal(ks[5], (Cmid,), dtype=jnp.float32)
    g2 = 1.0 + 0.1 * jax.random.normal(ks[6], (Cmid,), dtype=jnp.float32)
    b2 = 0.1 * jax.random.normal(ks[7], (Cmid,), dtype=jnp.float32)
    g3 = 1.0 + 0.1 * jax.random.normal(ks[8], (Cin,), dtype=jnp.float32)
    b3 = 0.1 * jax.random.normal(ks[9], (Cin,), dtype=jnp.float32)
    params = (w1, g1, b1, w2, g2, b2, w3, g3, b3)

    out = bottleneck_identify_psp(x, params, dilation=dilation)
    out = jax.block_until_ready(out)

    ref = _reference(x, params, dilation=dilation)
    assert out.shape == (N, Cin, H, W), out.shape
    if not jnp.allclose(out, ref, rtol=2e-4, atol=2e-4):
        err = jnp.max(jnp.abs(out - ref))
        raise AssertionError(f"Pallas kernel does not match reference (max abs err {err})")

    print("KERNEL_OK")
</pallas_src>

<mosaic_0001>
module attributes {stable_mosaic.version = 11 : i64} {
  func.func @_mm_stats_kernel(%arg0: i32, %arg1: memref<512x16xf32, #tpu.memory_space<vmem>>, %arg2: memref<16x4xf32, #tpu.memory_space<vmem>>, %arg3: memref<512x4xf32, #tpu.memory_space<vmem>>, %arg4: memref<1x4xf32, #tpu.memory_space<vmem>>, %arg5: memref<1x4xf32, #tpu.memory_space<vmem>>) attributes {dimension_semantics = [#tpu.dimension_semantics<arbitrary>], iteration_bounds = array<i64: 1>, scalar_prefetch = 0 : i64, scratch_operands = 0 : i64, tpu.core_type = #tpu.core_type<tc>, window_params = [{transform_indices = @transform_0, window_bounds = array<i64: 512, 16>}, {pipeline_mode = #tpu.pipeline_mode<synchronous>, transform_indices = @transform_1, window_bounds = array<i64: 16, 4>}, {transform_indices = @transform_2, window_bounds = array<i64: 512, 4>}, {pipeline_mode = #tpu.pipeline_mode<synchronous>, transform_indices = @transform_3, window_bounds = array<i64: 1, 4>}, {pipeline_mode = #tpu.pipeline_mode<synchronous>, transform_indices = @transform_4, window_bounds = array<i64: 1, 4>}]} {
    %c0_i32 = arith.constant 0 : i32
    %0 = arith.cmpi eq, %arg0, %c0_i32 : i32
    %1 = arith.extui %0 : i1 to i32
    %c0_i32_0 = arith.constant 0 : i32
    %2 = arith.cmpi ne, %1, %c0_i32_0 : i32
    scf.if %2 {
      %cst_16 = arith.constant 0.000000e+00 : f32
      %18 = vector.broadcast %cst_16 : f32 to vector<1x4xf32>
      %c0_17 = arith.constant 0 : index
      %c0_18 = arith.constant 0 : index
      %19 = vector.load %arg4[%c0_17, %c0_18] : memref<1x4xf32, #tpu.memory_space<vmem>>, vector<1x4xf32>
      tpu.vector_store %arg4[%c0_17, %c0_18], %18 {strides = array<i32>} : memref<1x4xf32, #tpu.memory_space<vmem>>, vector<1x4xf32>,
      %cst_19 = arith.constant 0.000000e+00 : f32
      %20 = vector.broadcast %cst_19 : f32 to vector<1x4xf32>
      %c0_20 = arith.constant 0 : index
      %c0_21 = arith.constant 0 : index
      %21 = vector.load %arg5[%c0_20, %c0_21] : memref<1x4xf32, #tpu.memory_space<vmem>>, vector<1x4xf32>
      tpu.vector_store %arg5[%c0_20, %c0_21], %20 {strides = array<i32>} : memref<1x4xf32, #tpu.memory_space<vmem>>, vector<1x4xf32>,
    } else {
    }
    %c0 = arith.constant 0 : index
    %c0_1 = arith.constant 0 : index
    %3 = vector.load %arg1[%c0, %c0_1] : memref<512x16xf32, #tpu.memory_space<vmem>>, vector<512x16xf32>
    %c0_2 = arith.constant 0 : index
    %c0_3 = arith.constant 0 : index
    %4 = vector.load %arg2[%c0_2, %c0_3] : memref<16x4xf32, #tpu.memory_space<vmem>>, vector<16x4xf32>
    %cst = arith.constant dense<0.000000e+00> : vector<512x4xf32>
    %5 = tpu.matmul %3, %4, %cst {dimension_numbers = #tpu.dot_dimension_numbers<[1], [0], [0], [1], [0, 0, 1, 1], [], []>} : vector<512x16xf32>, vector<16x4xf32>, vector<512x4xf32> -> vector<512x4xf32>
    %c0_4 = arith.constant 0 : index
    %c0_5 = arith.constant 0 : index
    %6 = vector.load %arg3[%c0_4, %c0_5] : memref<512x4xf32, #tpu.memory_space<vmem>>, vector<512x4xf32>
    tpu.vector_store %arg3[%c0_4, %c0_5], %5 {strides = array<i32>} : memref<512x4xf32, #tpu.memory_space<vmem>>, vector<512x4xf32>,
    %c0_6 = arith.constant 0 : index
    %c0_7 = arith.constant 0 : index
    %7 = vector.load %arg4[%c0_6, %c0_7] : memref<1x4xf32, #tpu.memory_space<vmem>>, vector<1x4xf32>
    %cst_8 = arith.constant dense<0.000000e+00> : vector<4xf32>
    %8 = vector.multi_reduction <add>, %5, %cst_8 [0] : vector<512x4xf32> to vector<4xf32>
    %9 = vector.shape_cast %8 : vector<4xf32> to vector<1x4xf32>
    %10 = arith.addf %7, %9 : vector<1x4xf32>
    %c0_9 = arith.constant 0 : index
    %c0_10 = arith.constant 0 : index
    %11 = vector.load %arg4[%c0_9, %c0_10] : memref<1x4xf32, #tpu.memory_space<vmem>>, vector<1x4xf32>
    tpu.vector_store %arg4[%c0_9, %c0_10], %10 {strides = array<i32>} : memref<1x4xf32, #tpu.memory_space<vmem>>, vector<1x4xf32>,
    %c0_11 = arith.constant 0 : index
    %c0_12 = arith.constant 0 : index
    %12 = vector.load %arg5[%c0_11, %c0_12] : memref<1x4xf32, #tpu.memory_space<vmem>>, vector<1x4xf32>
    %13 = arith.mulf %5, %5 : vector<512x4xf32>
    %cst_13 = arith.constant dense<0.000000e+00> : vector<4xf32>
    %14 = vector.multi_reduction <add>, %13, %cst_13 [0] : vector<512x4xf32> to vector<4xf32>
    %15 = vector.shape_cast %14 : vector<4xf32> to vector<1x4xf32>
    %16 = arith.addf %12, %15 : vector<1x4xf32>
    %c0_14 = arith.constant 0 : index
    %c0_15 = arith.constant 0 : index
    %17 = vector.load %arg5[%c0_14, %c0_15] : memref<1x4xf32, #tpu.memory_space<vmem>>, vector<1x4xf32>
    tpu.vector_store %arg5[%c0_14, %c0_15], %16 {strides = array<i32>} : memref<1x4xf32, #tpu.memory_space<vmem>>, vector<1x4xf32>,
    return
  }
  func.func @transform_0(%arg0: i32) -> (i32, i32) {
    %c0_i32 = arith.constant 0 : i32
    %c0_i32_0 = arith.constant 0 : i32
    return %arg0, %c0_i32 : i32, i32
  }
  func.func @transform_1(%arg0: i32) -> (i32, i32) {
    %c0_i32 = arith.constant 0 : i32
    %c0_i32_0 = arith.constant 0 : i32
    %c0_i32_1 = arith.constant 0 : i32
    return %c0_i32, %c0_i32_0 : i32, i32
  }
  func.func @transform_2(%arg0: i32) -> (i32, i32) {
    %c0_i32 = arith.constant 0 : i32
    %c0_i32_0 = arith.constant 0 : i32
    return %arg0, %c0_i32 : i32, i32
  }
  func.func @transform_3(%arg0: i32) -> (i32, i32) {
    %c0_i32 = arith.constant 0 : i32
    %c0_i32_0 = arith.constant 0 : i32
    %c0_i32_1 = arith.constant 0 : i32
    return %c0_i32, %c0_i32_0 : i32, i32
  }
  func.func @transform_4(%arg0: i32) -> (i32, i32) {
    %c0_i32 = arith.constant 0 : i32
    %c0_i32_0 = arith.constant 0 : i32
    %c0_i32_1 = arith.constant 0 : i32
    return %c0_i32, %c0_i32_0 : i32, i32
  }
}

</mosaic_0001>

<bundles_post_ra>
// kernel: tpu_custom_call.1
= control target key start
LH: loop header
LB: loop body
LE: loop exit
PB: predicated region body
PF: predicated region fallthrough
CT: control target
= control target key end

     0   :  { %10 = vsyncpa [#allocation3], 0  ;;  %vm89_vm0 = vcmask 130048   ;;  %s2290_s0 = inlined_call_operand.vmem [shape: f32[512,16], index: 0, kind: input, shape index: {}]   ;;  %s2291_s1 = inlined_call_operand.vmem [shape: f32[16,4], index: 1, kind: input, shape index: {}]   ;;  %s2292_s2 = inlined_call_operand.vmem [shape: f32[512,4], index: 2, kind: output, shape index: {0}]   ;;  %s2293_s3 = inlined_call_operand.hbm [shape: f32[1,4], index: 3, kind: output, shape index: {1}]   ;;  %s2294_s4 = inlined_call_operand.hbm [shape: f32[1,4], index: 4, kind: output, shape index: {2}]  }
   0x1   :  { %v87_v0 = vld [vmem:[%s2291_s1] sm:$0xff]  ;;  %v88_v1 = vld [vmem:[%s2291_s1 + $0x8] sm:$0xff]  ;;  %v25_v5 = vld [vmem:[%s2290_s0 + $0x10] sm:$0xff] }
   0x2   :  { %v23_v2 = vld [vmem:[%s2290_s0] sm:$0xff]  ;;  %v1331_v3 = vpack.c.bf16 %v88_v1, %v87_v0  ;;  %v24_v4 = vld [vmem:[%s2290_s0 + $0x8] sm:$0xff]  ;;  %v26_v6 = vld [vmem:[%s2290_s0 + $0x18] sm:$0xff] }
   0x3   :  { %1235 = vmatprep.mubr.msk.f32.mxu0 %vm89_vm0, %v23_v2  ;;  %v27_v7 = vld [vmem:[%s2290_s0 + $0x20] sm:$0xff]  ;;  %v56_v9 = vld [vmem:[%s2290_s0 + $0x108] sm:$0xff]  ;;  %v57_v11 = vld [vmem:[%s2290_s0 + $0x110] sm:$0xff] }
   0x4   :  { %1332 = vmatprep.subr.bf16.mxu0 %v1331_v3  ;;  %1335 = vmatprep.subr.bf16.mxu1 %v1331_v3  ;;  %v55_v8 = vld [vmem:[%s2290_s0 + $0x100] sm:$0xff]  ;;  %v28_v10 = vld [vmem:[%s2290_s0 + $0x28] sm:$0xff]  ;;  %v29_v12 = vld [vmem:[%s2290_s0 + $0x30] sm:$0xff] }
   0x5   :  { %1334 = vmatpush3.bf16.msra.mxu0 %v1331_v3  ;;  %1336 = vmatpush3.bf16.msra.mxu1 %v1331_v3  ;;  %v58_v13 = vld [vmem:[%s2290_s0 + $0x118] sm:$0xff]  ;;  %v59_v14 = vld [vmem:[%s2290_s0 + $0x120] sm:$0xff]  ;;  %v60_v17 = vld [vmem:[%s2290_s0 + $0x128] sm:$0xff] }
   0x6   :  { %1283 = vmatprep.mubr.msk.f32.mxu1 %vm89_vm0, %v55_v8  ;;  %v30_v15 = vld [vmem:[%s2290_s0 + $0x38] sm:$0xff]  ;;  %v31_v16 = vld [vmem:[%s2290_s0 + $0x40] sm:$0xff]  ;;  %v61_v18 = vld [vmem:[%s2290_s0 + $0x130] sm:$0xff] }
   0x7   :  { %v32_v19 = vld [vmem:[%s2290_s0 + $0x48] sm:$0xff]  ;;  %v33_v20 = vld [vmem:[%s2290_s0 + $0x50] sm:$0xff]  ;;  %v62_v21 = vld [vmem:[%s2290_s0 + $0x138] sm:$0xff] }
   0x8   :  { %1236 = vmatmul.mubr.msk.f32.vlgmr.msra.gmra.mrb[0].mxu0 %vm89_vm0, %v24_v4  ;;  %1284 = vmatmul.mubr.msk.f32.vlgmr.msra.gmra.mrb[0].mxu1 %vm89_vm0, %v56_v9 }
   0x9   :  { %1238 = vmatprep.mubr.msk.f32.mxu0 %vm89_vm0, %v25_v5  ;;  %1286 = vmatprep.mubr.msk.f32.mxu1 %vm89_vm0, %v57_v11 }
   0xc   :  { %1239 = vmatmul.mubr.msk.f32.gmra.mrb[2].mxu0 %vm89_vm0, %v26_v6  ;;  %1287 = vmatmul.mubr.msk.f32.gmra.mrb[2].mxu1 %vm89_vm0, %v58_v13 }
   0xd   :  { %1241 = vmatprep.mubr.msk.f32.mxu0 %vm89_vm0, %v27_v7  ;;  %1289 = vmatprep.mubr.msk.f32.mxu1 %vm89_vm0, %v59_v14 }
  0x10   :  { %1242 = vmatmul.mubr.msk.f32.gmra.mrb[4].mxu0 %vm89_vm0, %v28_v10  ;;  %1290 = vmatmul.mubr.msk.f32.gmra.mrb[4].mxu1 %vm89_vm0, %v60_v17 }
  0x11   :  { %1244 = vmatprep.mubr.msk.f32.mxu0 %vm89_vm0, %v29_v12  ;;  %1292 = vmatprep.mubr.msk.f32.mxu1 %vm89_vm0, %v61_v18 }
  0x14   :  { %1245 = vmatmul.mubr.msk.f32.gmra.mrb[6].mxu0 %vm89_vm0, %v30_v15 }
  0x15   :  { %1247 = vmatprep.mubr.msk.f32.mxu0 %vm89_vm0, %v31_v16 }
  0x16   :  { %11 = vsyncpa [#allocation5], 0  ;;  %v63_v22 = vld [vmem:[%s2290_s0 + $0x140] sm:$0xff]  ;;  %v34_v23 = vld [vmem:[%s2290_s0 + $0x58] sm:$0xff]  ;;  %1293 = vmatmul.mubr.msk.f32.gmra.mrb[6].mxu1 %vm89_vm0, %v62_v21  ;;  %vm667_vm1 = vcmask 31744   ;;  %vm20_vm2 = vcmask 24576  }
  0x17   :  { %v35_v24 = vld [vmem:[%s2290_s0 + $0x60] sm:$0xff]  ;;  %1295 = vmatprep.mubr.msk.f32.mxu1 %vm89_vm0, %v63_v22  ;;  %v64_v25 = vld [vmem:[%s2290_s0 + $0x148] sm:$0xff]  ;;  %v65_v26 = vld [vmem:[%s2290_s0 + $0x150] sm:$0xff]  ;;  %v1388_v21 = vmov 0.0   ;;  %s1390_s27 = smov [#allocation4]  }
  0x18   :  { %1248 = vmatmul.mubr.msk.f32.gmra.mrb[8].mxu0 %vm89_vm0, %v32_v19  ;;  %v36_v27 = vld [vmem:[%s2290_s0 + $0x68] sm:$0xff]  ;;  %v37_v28 = vld [vmem:[%s2290_s0 + $0x70] sm:$0xff]  ;;  %v66_v29 = vld [vmem:[%s2290_s0 + $0x158] sm:$0xff]  ;;  %21 = vst.msk [vmem:[#allocation2] sm:$0x1] %vm20_vm2, %v1388_v21  ;;  %s1087_s28 = sshll.u32 %s1390_s27, 4  ;;  %s2257_s28 = int_to_ptr.vmem [resolvable:$true] %s1087_s28 }
  0x19   :  { %1250 = vmatprep.mubr.msk.f32.mxu0 %vm89_vm0, %v33_v20  ;;  %v67_v30 = vld [vmem:[%s2290_s0 + $0x160] sm:$0xff]  ;;  %v38_v31 = vld [vmem:[%s2290_s0 + $0x78] sm:$0xff]  ;;  %v68_v33 = vld [vmem:[%s2290_s0 + $0x168] sm:$0xff]  ;;  %22 = vst.msk [vmem:[#allocation4] sm:$0x1] %vm20_vm2, %v1388_v21 }
  0x1a   :  { %1296 = vmatmul.mubr.msk.f32.gmra.mrb[8].mxu1 %vm89_vm0, %v64_v25  ;;  %v39_v32 = vld [vmem:[%s2290_s0 + $0x80] sm:$0xff]  ;;  %v69_v34 = vld [vmem:[%s2290_s0 + $0x170] sm:$0xff]  ;;  %v40_v35 = vld [vmem:[%s2290_s0 + $0x88] sm:$0xff] }
  0x1b   :  { %1298 = vmatprep.mubr.msk.f32.mxu1 %vm89_vm0, %v65_v26  ;;  %v41_v36 = vld [vmem:[%s2290_s0 + $0x90] sm:$0xff]  ;;  %v70_v37 = vld [vmem:[%s2290_s0 + $0x178] sm:$0xff]  ;;  %v71_v38 = vld [vmem:[%s2290_s0 + $0x180] sm:$0xff] }
  0x1c   :  { %1251 = vmatmul.mubr.msk.f32.gmra.mrb[10].mxu0 %vm89_vm0, %v34_v23  ;;  %v42_v39 = vld [vmem:[%s2290_s0 + $0x98] sm:$0xff]  ;;  %v43_v40 = vld [vmem:[%s2290_s0 + $0xa0] sm:$0xff]  ;;  %v72_v41 = vld [vmem:[%s2290_s0 + $0x188] sm:$0xff] }
  0x1d   :  { %1253 = vmatprep.mubr.msk.f32.mxu0 %vm89_vm0, %v35_v24  ;;  %v73_v42 = vld [vmem:[%s2290_s0 + $0x190] sm:$0xff]  ;;  %v44_v43 = vld [vmem:[%s2290_s0 + $0xa8] sm:$0xff]  ;;  %v74_v45 = vld [vmem:[%s2290_s0 + $0x198] sm:$0xff] }
  0x1e   :  { %1299 = vmatmul.mubr.msk.f32.gmra.mrb[10].mxu1 %vm89_vm0, %v66_v29  ;;  %v45_v44 = vld [vmem:[%s2290_s0 + $0xb0] sm:$0xff]  ;;  %v75_v46 = vld [vmem:[%s2290_s0 + $0x1a0] sm:$0xff]  ;;  %v46_v47 = vld [vmem:[%s2290_s0 + $0xb8] sm:$0xff] }
  0x1f   :  { %1301 = vmatprep.mubr.msk.f32.mxu1 %vm89_vm0, %v67_v30  ;;  %v47_v48 = vld [vmem:[%s2290_s0 + $0xc0] sm:$0xff]  ;;  %v76_v49 = vld [vmem:[%s2290_s0 + $0x1a8] sm:$0xff]  ;;  %v77_v50 = vld [vmem:[%s2290_s0 + $0x1b0] sm:$0xff] }
  0x20   :  { %1254 = vmatmul.mubr.msk.f32.gmra.mrb[12].mxu0 %vm89_vm0, %v36_v27  ;;  %v48_v51 = vld [vmem:[%s2290_s0 + $0xc8] sm:$0xff]  ;;  %v49_v52 = vld [vmem:[%s2290_s0 + $0xd0] sm:$0xff]  ;;  %v78_v53 = vld [vmem:[%s2290_s0 + $0x1b8] sm:$0xff] }
  0x21   :  { %1256 = vmatprep.mubr.msk.f32.mxu0 %vm89_vm0, %v37_v28  ;;  %v79_v54 = vld [vmem:[%s2290_s0 + $0x1c0] sm:$0xff]  ;;  %v50_v55 = vld [vmem:[%s2290_s0 + $0xd8] sm:$0xff]  ;;  %v80_v57 = vld [vmem:[%s2290_s0 + $0x1c8] sm:$0xff] }
  0x22   :  { %1302 = vmatmul.mubr.msk.f32.gmra.mrb[12].mxu1 %vm89_vm0, %v68_v33  ;;  %v51_v56 = vld [vmem:[%s2290_s0 + $0xe0] sm:$0xff]  ;;  %v81_v58 = vld [vmem:[%s2290_s0 + $0x1d0] sm:$0xff]  ;;  %v52_v59 = vld [vmem:[%s2290_s0 + $0xe8] sm:$0xff] }
  0x23   :  { %1304 = vmatprep.mubr.msk.f32.mxu1 %vm89_vm0, %v69_v34  ;;  %v53_v60 = vld [vmem:[%s2290_s0 + $0xf0] sm:$0xff]  ;;  %v82_v61 = vld [vmem:[%s2290_s0 + $0x1d8] sm:$0xff]  ;;  %v83_v62 = vld [vmem:[%s2290_s0 + $0x1e0] sm:$0xff] }
  0x24   :  { %1257 = vmatmul.mubr.msk.f32.gmra.mrb[14].mxu0 %vm89_vm0, %v38_v31  ;;  %v54_v63 = vld [vmem:[%s2290_s0 + $0xf8] sm:$0xff]  ;;  %v84_v0 = vld [vmem:[%s2290_s0 + $0x1e8] sm:$0xff]  ;;  %v85_v1 = vld [vmem:[%s2290_s0 + $0x1f0] sm:$0xff] }
  0x25   :  { %1259 = vmatprep.mubr.msk.f32.mxu0 %vm89_vm0, %v39_v32  ;;  %v86_v2 = vld [vmem:[%s2290_s0 + $0x1f8] sm:$0xff] }
  0x26   :  { %1305 = vmatmul.mubr.msk.f32.gmra.mrb[14].mxu1 %vm89_vm0, %v70_v37 }
  0x27   :  { %1307 = vmatprep.mubr.msk.f32.mxu1 %vm89_vm0, %v71_v38 }
  0x28   :  { %1260 = vmatmul.mubr.msk.f32.gmra.mrb[16].mxu0 %vm89_vm0, %v40_v35 }
  0x29   :  { %1262 = vmatprep.mubr.msk.f32.mxu0 %vm89_vm0, %v41_v36 }
  0x2a   :  { %1308 = vmatmul.mubr.msk.f32.gmra.mrb[16].mxu1 %vm89_vm0, %v72_v41 }
  0x2b   :  { %1310 = vmatprep.mubr.msk.f32.mxu1 %vm89_vm0, %v73_v42 }
  0x2c   :  { %1263 = vmatmul.mubr.msk.f32.gmra.mrb[18].mxu0 %vm89_vm0, %v42_v39 }
  0x2d   :  { %1265 = vmatprep.mubr.msk.f32.mxu0 %vm89_vm0, %v43_v40 }
  0x2e   :  { %1311 = vmatmul.mubr.msk.f32.gmra.mrb[18].mxu1 %vm89_vm0, %v74_v45 }
  0x2f   :  { %1313 = vmatprep.mubr.msk.f32.mxu1 %vm89_vm0, %v75_v46 }
  0x30   :  { %1266 = vmatmul.mubr.msk.f32.gmra.mrb[20].mxu0 %vm89_vm0, %v44_v43 }
  0x31   :  { %1268 = vmatprep.mubr.msk.f32.mxu0 %vm89_vm0, %v45_v44 }
  0x32   :  { %1314 = vmatmul.mubr.msk.f32.gmra.mrb[20].mxu1 %vm89_vm0, %v76_v49 }
  0x33   :  { %1316 = vmatprep.mubr.msk.f32.mxu1 %vm89_vm0, %v77_v50 }
  0x34   :  { %1269 = vmatmul.mubr.msk.f32.gmra.mrb[22].mxu0 %vm89_vm0, %v46_v47 }
  0x35   :  { %1271 = vmatprep.mubr.msk.f32.mxu0 %vm89_vm0, %v47_v48 }
  0x36   :  { %1317 = vmatmul.mubr.msk.f32.gmra.mrb[22].mxu1 %vm89_vm0, %v78_v53 }
  0x37   :  { %1319 = vmatprep.mubr.msk.f32.mxu1 %vm89_vm0, %v79_v54 }
  0x38   :  { %1272 = vmatmul.mubr.msk.f32.gmra.mrb[24].mxu0 %vm89_vm0, %v48_v51 }
  0x39   :  { %1274 = vmatprep.mubr.msk.f32.mxu0 %vm89_vm0, %v49_v52 }
  0x3a   :  { %1320 = vmatmul.mubr.msk.f32.gmra.mrb[24].mxu1 %vm89_vm0, %v80_v57 }
  0x3b   :  { %1322 = vmatprep.mubr.msk.f32.mxu1 %vm89_vm0, %v81_v58 }
  0x3c   :  { %1275 = vmatmul.mubr.msk.f32.gmra.mrb[26].mxu0 %vm89_vm0, %v50_v55 }
  0x3d   :  { %1277 = vmatprep.mubr.msk.f32.mxu0 %vm89_vm0, %v51_v56 }
  0x3e   :  { %1323 = vmatmul.mubr.msk.f32.gmra.mrb[26].mxu1 %vm89_vm0, %v82_v61 }
  0x3f   :  { %1325 = vmatprep.mubr.msk.f32.mxu1 %vm89_vm0, %v83_v62 }
  0x40   :  { %1278 = vmatmul.mubr.msk.f32.gmra.mrb[28].mxu0 %vm89_vm0, %v52_v59 }
  0x41   :  { %1280 = vmatprep.mubr.msk.f32.mxu0 %vm89_vm0, %v53_v60 }
  0x42   :  { %1326 = vmatmul.mubr.msk.f32.gmra.mrb[28].mxu1 %vm89_vm0, %v84_v0 }
  0x43   :  { %1328 = vmatprep.mubr.msk.f32.mxu1 %vm89_vm0, %v85_v1 }
  0x44   :  { %1281 = vmatmul.mubr.msk.f32.gmra.mrb[30].mxu0 %vm89_vm0, %v54_v63 }
  0x46   :  { %1329 = vmatmul.mubr.msk.f32.gmra.mrb[30].mxu1 %vm89_vm0, %v86_v2 }
  0xdb   :  { %v1237_v3 = vpop.f32.mrb[0].mxu0  ;;  %v1699_v18 = vpop.f32.mrb[0].mxu1 }
  0xdc   :  { %669 = vst.msk [vmem:[%s2292_s2 + $0x8] sm:$0xff] %vm667_vm1, %v1237_v3  ;;  %v734_v4 = vsel %vm667_vm1, %v1237_v3, 0.0  ;;  %v871_v5 = vmul.f32 %v1237_v3, %v1237_v3  ;;  %v348_v6 = vpop.f32.mrb[1].mxu0  ;;  %701 = vst.msk [vmem:[%s2292_s2 + $0x108] sm:$0xff] %vm667_vm1, %v1699_v18  ;;  %v1706_v20 = vpop.f32.mrb[1].mxu1 }
  0xdd   :  { %668 = vst.msk [vmem:[%s2292_s2] sm:$0xff] %vm667_vm1, %v348_v6  ;;  %v733_v7 = vsel %vm667_vm1, %v348_v6, 0.0  ;;  %v870_v8 = vmul.f32 %v348_v6, %v348_v6  ;;  %700 = vst.msk [vmem:[%s2292_s2 + $0x100] sm:$0xff] %vm667_vm1, %v1706_v20 }
  0xde   :  { %v935_v9 = vsel %vm667_vm1, %v871_v5, 0.0  ;;  %v735_v10 = vadd.f32 %v734_v4, %v733_v7 }
  0xdf   :  { %v934_v11 = vsel %vm667_vm1, %v870_v8, 0.0  ;;  %v1240_v12 = vpop.f32.mrb[2].mxu0  ;;  %v1727_v32 = vpop.f32.mrb[2].mxu1 }
  0xe0   :  { %v936_v13 = vadd.f32 %v935_v9, %v934_v11  ;;  %671 = vst.msk [vmem:[%s2292_s2 + $0x18] sm:$0xff] %vm667_vm1, %v1240_v12  ;;  %v873_v14 = vmul.f32 %v1240_v12, %v1240_v12  ;;  %v358_v15 = vpop.f32.mrb[3].mxu0  ;;  %v738_v22 = vsel %vm667_vm1, %v1240_v12, 0.0  ;;  %703 = vst.msk [vmem:[%s2292_s2 + $0x118] sm:$0xff] %vm667_vm1, %v1727_v32  ;;  %v1734_v35 = vpop.f32.mrb[3].mxu1 }
  0xe1   :  { %670 = vst.msk [vmem:[%s2292_s2 + $0x10] sm:$0xff] %vm667_vm1, %v358_v15  ;;  %v736_v16 = vsel %vm667_vm1, %v358_v15, 0.0  ;;  %v872_v17 = vmul.f32 %v358_v15, %v358_v15  ;;  %702 = vst.msk [vmem:[%s2292_s2 + $0x110] sm:$0xff] %vm667_vm1, %v1734_v35 }
  0xe2   :  { %v737_v19 = vadd.f32 %v736_v16, %v735_v10  ;;  %v939_v28 = vsel %vm667_vm1, %v873_v14, 0.0 }
  0xe3   :  { %v937_v23 = vsel %vm667_vm1, %v872_v17, 0.0  ;;  %v1243_v24 = vpop.f32.mrb[4].mxu0  ;;  %v1753_v46 = vpop.f32.mrb[4].mxu1 }
  0xe4   :  { %v938_v25 = vadd.f32 %v937_v23, %v936_v13  ;;  %673 = vst.msk [vmem:[%s2292_s2 + $0x28] sm:$0xff] %vm667_vm1, %v1243_v24  ;;  %v368_v26 = vpop.f32.mrb[5].mxu0  ;;  %v739_v27 = vadd.f32 %v738_v22, %v737_v19  ;;  %v875_v29 = vmul.f32 %v1243_v24, %v1243_v24  ;;  %v742_v36 = vsel %vm667_vm1, %v1243_v24, 0.0  ;;  %705 = vst.msk [vmem:[%s2292_s2 + $0x128] sm:$0xff] %vm667_vm1, %v1753_v46  ;;  %v1760_v49 = vpop.f32.mrb[5].mxu1 }
  0xe5   :  { %672 = vst.msk [vmem:[%s2292_s2 + $0x20] sm:$0xff] %vm667_vm1, %v368_v26  ;;  %v740_v30 = vsel %vm667_vm1, %v368_v26, 0.0  ;;  %v874_v31 = vmul.f32 %v368_v26, %v368_v26  ;;  %704 = vst.msk [vmem:[%s2292_s2 + $0x120] sm:$0xff] %vm667_vm1, %v1760_v49 }
  0xe6   :  { %v741_v33 = vadd.f32 %v740_v30, %v739_v27  ;;  %v940_v34 = vadd.f32 %v939_v28, %v938_v25  ;;  %v943_v42 = vsel %vm667_vm1, %v875_v29, 0.0 }
  0xe7   :  { %v941_v37 = vsel %vm667_vm1, %v874_v31, 0.0  ;;  %v1246_v38 = vpop.f32.mrb[6].mxu0 }
  0xe8   :  { %v942_v39 = vadd.f32 %v941_v37, %v940_v34  ;;  %675 = vst.msk [vmem:[%s2292_s2 + $0x38] sm:$0xff] %vm667_vm1, %v1246_v38  ;;  %v378_v40 = vpop.f32.mrb[7].mxu0  ;;  %v743_v41 = vadd.f32 %v742_v36, %v741_v33  ;;  %v877_v43 = vmul.f32 %v1246_v38, %v1246_v38  ;;  %v746_v50 = vsel %vm667_vm1, %v1246_v38, 0.0 }
  0xe9   :  { %674 = vst.msk [vmem:[%s2292_s2 + $0x30] sm:$0xff] %vm667_vm1, %v378_v40  ;;  %v744_v44 = vsel %vm667_vm1, %v378_v40, 0.0  ;;  %v876_v45 = vmul.f32 %v378_v40, %v378_v40  ;;  %v1779_v60 = vpop.f32.mrb[6].mxu1 }
  0xea   :  { %v745_v47 = vadd.f32 %v744_v44, %v743_v41  ;;  %v944_v48 = vadd.f32 %v943_v42, %v942_v39  ;;  %v947_v56 = vsel %vm667_vm1, %v877_v43, 0.0  ;;  %707 = vst.msk [vmem:[%s2292_s2 + $0x138] sm:$0xff] %vm667_vm1, %v1779_v60  ;;  %v1786_v63 = vpop.f32.mrb[7].mxu1 }
  0xeb   :  { %v945_v51 = vsel %vm667_vm1, %v876_v45, 0.0  ;;  %v1249_v52 = vpop.f32.mrb[8].mxu0  ;;  %706 = vst.msk [vmem:[%s2292_s2 + $0x130] sm:$0xff] %vm667_vm1, %v1786_v63 }
  0xec   :  { %v946_v53 = vadd.f32 %v945_v51, %v944_v48  ;;  %677 = vst.msk [vmem:[%s2292_s2 + $0x48] sm:$0xff] %vm667_vm1, %v1249_v52  ;;  %v388_v54 = vpop.f32.mrb[9].mxu0  ;;  %v747_v55 = vadd.f32 %v746_v50, %v745_v47  ;;  %v879_v57 = vmul.f32 %v1249_v52, %v1249_v52  ;;  %v750_v0 = vsel %vm667_vm1, %v1249_v52, 0.0 }
  0xed   :  { %676 = vst.msk [vmem:[%s2292_s2 + $0x40] sm:$0xff] %vm667_vm1, %v388_v54  ;;  %v748_v58 = vsel %vm667_vm1, %v388_v54, 0.0  ;;  %v878_v59 = vmul.f32 %v388_v54, %v388_v54  ;;  %v1805_v10 = vpop.f32.mrb[8].mxu1 }
  0xee   :  { %v749_v61 = vadd.f32 %v748_v58, %v747_v55  ;;  %v948_v62 = vadd.f32 %v947_v56, %v946_v53  ;;  %v951_v6 = vsel %vm667_vm1, %v879_v57, 0.0  ;;  %709 = vst.msk [vmem:[%s2292_s2 + $0x148] sm:$0xff] %vm667_vm1, %v1805_v10  ;;  %v1812_v13 = vpop.f32.mrb[9].mxu1 }
  0xef   :  { %v949_v1 = vsel %vm667_vm1, %v878_v59, 0.0  ;;  %v1252_v2 = vpop.f32.mrb[10].mxu0  ;;  %708 = vst.msk [vmem:[%s2292_s2 + $0x140] sm:$0xff] %vm667_vm1, %v1812_v13 }
  0xf0   :  { %v950_v3 = vadd.f32 %v949_v1, %v948_v62  ;;  %679 = vst.msk [vmem:[%s2292_s2 + $0x58] sm:$0xff] %vm667_vm1, %v1252_v2  ;;  %v398_v4 = vpop.f32.mrb[11].mxu0  ;;  %v751_v5 = vadd.f32 %v750_v0, %v749_v61  ;;  %v881_v7 = vmul.f32 %v1252_v2, %v1252_v2  ;;  %v754_v14 = vsel %vm667_vm1, %v1252_v2, 0.0 }
  0xf1   :  { %678 = vst.msk [vmem:[%s2292_s2 + $0x50] sm:$0xff] %vm667_vm1, %v398_v4  ;;  %v752_v8 = vsel %vm667_vm1, %v398_v4, 0.0  ;;  %v880_v9 = vmul.f32 %v398_v4, %v398_v4  ;;  %v1831_v26 = vpop.f32.mrb[10].mxu1 }
  0xf2   :  { %v753_v11 = vadd.f32 %v752_v8, %v751_v5  ;;  %v952_v12 = vadd.f32 %v951_v6, %v950_v3  ;;  %v955_v22 = vsel %vm667_vm1, %v881_v7, 0.0  ;;  %711 = vst.msk [vmem:[%s2292_s2 + $0x158] sm:$0xff] %vm667_vm1, %v1831_v26  ;;  %v1838_v29 = vpop.f32.mrb[11].mxu1 }
  0xf3   :  { %v953_v15 = vsel %vm667_vm1, %v880_v9, 0.0  ;;  %v1255_v16 = vpop.f32.mrb[12].mxu0  ;;  %710 = vst.msk [vmem:[%s2292_s2 + $0x150] sm:$0xff] %vm667_vm1, %v1838_v29 }
  0xf4   :  { %v954_v17 = vadd.f32 %v953_v15, %v952_v12  ;;  %681 = vst.msk [vmem:[%s2292_s2 + $0x68] sm:$0xff] %vm667_vm1, %v1255_v16  ;;  %v408_v19 = vpop.f32.mrb[13].mxu0  ;;  %v755_v21 = vadd.f32 %v754_v14, %v753_v11  ;;  %v883_v23 = vmul.f32 %v1255_v16, %v1255_v16  ;;  %v758_v30 = vsel %vm667_vm1, %v1255_v16, 0.0 }
  0xf5   :  { %680 = vst.msk [vmem:[%s2292_s2 + $0x60] sm:$0xff] %vm667_vm1, %v408_v19  ;;  %v756_v24 = vsel %vm667_vm1, %v408_v19, 0.0  ;;  %v882_v25 = vmul.f32 %v408_v19, %v408_v19  ;;  %v1857_v42 = vpop.f32.mrb[12].mxu1 }
  0xf6   :  { %v757_v27 = vadd.f32 %v756_v24, %v755_v21  ;;  %v956_v28 = vadd.f32 %v955_v22, %v954_v17  ;;  %v959_v38 = vsel %vm667_vm1, %v883_v23, 0.0  ;;  %713 = vst.msk [vmem:[%s2292_s2 + $0x168] sm:$0xff] %vm667_vm1, %v1857_v42  ;;  %v1864_v45 = vpop.f32.mrb[13].mxu1 }
  0xf7   :  { %v957_v31 = vsel %vm667_vm1, %v882_v25, 0.0  ;;  %v1258_v33 = vpop.f32.mrb[14].mxu0  ;;  %712 = vst.msk [vmem:[%s2292_s2 + $0x160] sm:$0xff] %vm667_vm1, %v1864_v45 }
  0xf8   :  { %v958_v34 = vadd.f32 %v957_v31, %v956_v28  ;;  %683 = vst.msk [vmem:[%s2292_s2 + $0x78] sm:$0xff] %vm667_vm1, %v1258_v33  ;;  %v418_v36 = vpop.f32.mrb[15].mxu0  ;;  %v759_v37 = vadd.f32 %v758_v30, %v757_v27  ;;  %v885_v39 = vmul.f32 %v1258_v33, %v1258_v33  ;;  %v762_v47 = vsel %vm667_vm1, %v1258_v33, 0.0 }
  0xf9   :  { %682 = vst.msk [vmem:[%s2292_s2 + $0x70] sm:$0xff] %vm667_vm1, %v418_v36  ;;  %v760_v40 = vsel %vm667_vm1, %v418_v36, 0.0  ;;  %v884_v41 = vmul.f32 %v418_v36, %v418_v36  ;;  %v1883_v58 = vpop.f32.mrb[14].mxu1 }
  0xfa   :  { %v761_v43 = vadd.f32 %v760_v40, %v759_v37  ;;  %v960_v44 = vadd.f32 %v959_v38, %v958_v34  ;;  %v963_v54 = vsel %vm667_vm1, %v885_v39, 0.0  ;;  %715 = vst.msk [vmem:[%s2292_s2 + $0x178] sm:$0xff] %vm667_vm1, %v1883_v58  ;;  %v1890_v62 = vpop.f32.mrb[15].mxu1 }
  0xfb   :  { %v961_v48 = vsel %vm667_vm1, %v884_v41, 0.0  ;;  %v1261_v50 = vpop.f32.mrb[16].mxu0  ;;  %714 = vst.msk [vmem:[%s2292_s2 + $0x170] sm:$0xff] %vm667_vm1, %v1890_v62 }
  0xfc   :  { %v962_v51 = vadd.f32 %v961_v48, %v960_v44  ;;  %685 = vst.msk [vmem:[%s2292_s2 + $0x88] sm:$0xff] %vm667_vm1, %v1261_v50  ;;  %v428_v52 = vpop.f32.mrb[17].mxu0  ;;  %v763_v53 = vadd.f32 %v762_v47, %v761_v43  ;;  %v887_v55 = vmul.f32 %v1261_v50, %v1261_v50  ;;  %v766_v0 = vsel %vm667_vm1, %v1261_v50, 0.0 }
  0xfd   :  { %684 = vst.msk [vmem:[%s2292_s2 + $0x80] sm:$0xff] %vm667_vm1, %v428_v52  ;;  %v764_v56 = vsel %vm667_vm1, %v428_v52, 0.0  ;;  %v886_v57 = vmul.f32 %v428_v52, %v428_v52  ;;  %v1909_v11 = vpop.f32.mrb[16].mxu1 }
  0xfe   :  { %v765_v59 = vadd.f32 %v764_v56, %v763_v53  ;;  %v964_v61 = vadd.f32 %v963_v54, %v962_v51  ;;  %v967_v6 = vsel %vm667_vm1, %v887_v55, 0.0  ;;  %717 = vst.msk [vmem:[%s2292_s2 + $0x188] sm:$0xff] %vm667_vm1, %v1909_v11  ;;  %v1916_v15 = vpop.f32.mrb[17].mxu1 }
  0xff   :  { %v965_v1 = vsel %vm667_vm1, %v886_v57, 0.0  ;;  %v1264_v2 = vpop.f32.mrb[18].mxu0  ;;  %716 = vst.msk [vmem:[%s2292_s2 + $0x180] sm:$0xff] %vm667_vm1, %v1916_v15 }
 0x100   :  { %v966_v3 = vadd.f32 %v965_v1, %v964_v61  ;;  %687 = vst.msk [vmem:[%s2292_s2 + $0x98] sm:$0xff] %vm667_vm1, %v1264_v2  ;;  %v438_v4 = vpop.f32.mrb[19].mxu0  ;;  %v767_v5 = vadd.f32 %v766_v0, %v765_v59  ;;  %v889_v7 = vmul.f32 %v1264_v2, %v1264_v2  ;;  %v770_v16 = vsel %vm667_vm1, %v1264_v2, 0.0 }
 0x101   :  { %686 = vst.msk [vmem:[%s2292_s2 + $0x90] sm:$0xff] %vm667_vm1, %v438_v4  ;;  %v768_v8 = vsel %vm667_vm1, %v438_v4, 0.0  ;;  %v888_v9 = vmul.f32 %v438_v4, %v438_v4  ;;  %v1935_v30 = vpop.f32.mrb[18].mxu1 }
 0x102   :  { %v769_v12 = vadd.f32 %v768_v8, %v767_v5  ;;  %v968_v14 = vadd.f32 %v967_v6, %v966_v3  ;;  %v971_v24 = vsel %vm667_vm1, %v889_v7, 0.0  ;;  %719 = vst.msk [vmem:[%s2292_s2 + $0x198] sm:$0xff] %vm667_vm1, %v1935_v30  ;;  %v1942_v34 = vpop.f32.mrb[19].mxu1 }
 0x103   :  { %v969_v17 = vsel %vm667_vm1, %v888_v9, 0.0  ;;  %v1267_v19 = vpop.f32.mrb[20].mxu0  ;;  %718 = vst.msk [vmem:[%s2292_s2 + $0x190] sm:$0xff] %vm667_vm1, %v1942_v34 }
 0x104   :  { %v970_v21 = vadd.f32 %v969_v17, %v968_v14  ;;  %689 = vst.msk [vmem:[%s2292_s2 + $0xa8] sm:$0xff] %vm667_vm1, %v1267_v19  ;;  %v448_v22 = vpop.f32.mrb[21].mxu0  ;;  %v771_v23 = vadd.f32 %v770_v16, %v769_v12  ;;  %v891_v25 = vmul.f32 %v1267_v19, %v1267_v19  ;;  %v774_v36 = vsel %vm667_vm1, %v1267_v19, 0.0 }
 0x105   :  { %688 = vst.msk [vmem:[%s2292_s2 + $0xa0] sm:$0xff] %vm667_vm1, %v448_v22  ;;  %v772_v27 = vsel %vm667_vm1, %v448_v22, 0.0  ;;  %v890_v28 = vmul.f32 %v448_v22, %v448_v22  ;;  %v1961_v50 = vpop.f32.mrb[20].mxu1 }
 0x106   :  { %v773_v31 = vadd.f32 %v772_v27, %v771_v23  ;;  %v972_v33 = vadd.f32 %v971_v24, %v970_v21  ;;  %v975_v43 = vsel %vm667_vm1, %v891_v25, 0.0  ;;  %721 = vst.msk [vmem:[%s2292_s2 + $0x1a8] sm:$0xff] %vm667_vm1, %v1961_v50  ;;  %v1968_v53 = vpop.f32.mrb[21].mxu1 }
 0x107   :  { %v973_v37 = vsel %vm667_vm1, %v890_v28, 0.0  ;;  %v1270_v38 = vpop.f32.mrb[22].mxu0  ;;  %720 = vst.msk [vmem:[%s2292_s2 + $0x1a0] sm:$0xff] %vm667_vm1, %v1968_v53 }
 0x108   :  { %v974_v39 = vadd.f32 %v973_v37, %v972_v33  ;;  %691 = vst.msk [vmem:[%s2292_s2 + $0xb8] sm:$0xff] %vm667_vm1, %v1270_v38  ;;  %v458_v40 = vpop.f32.mrb[23].mxu0  ;;  %v775_v41 = vadd.f32 %v774_v36, %v773_v31  ;;  %v893_v44 = vmul.f32 %v1270_v38, %v1270_v38  ;;  %v778_v54 = vsel %vm667_vm1, %v1270_v38, 0.0 }
 0x109   :  { %690 = vst.msk [vmem:[%s2292_s2 + $0xb0] sm:$0xff] %vm667_vm1, %v458_v40  ;;  %v776_v47 = vsel %vm667_vm1, %v458_v40, 0.0  ;;  %v892_v48 = vmul.f32 %v458_v40, %v458_v40  ;;  %v1987_v4 = vpop.f32.mrb[22].mxu1 }
 0x10a   :  { %v777_v51 = vadd.f32 %v776_v47, %v775_v41  ;;  %v976_v52 = vadd.f32 %v975_v43, %v974_v39  ;;  %v979_v0 = vsel %vm667_vm1, %v893_v44, 0.0  ;;  %723 = vst.msk [vmem:[%s2292_s2 + $0x1b8] sm:$0xff] %vm667_vm1, %v1987_v4  ;;  %v1994_v7 = vpop.f32.mrb[23].mxu1 }
 0x10b   :  { %v977_v55 = vsel %vm667_vm1, %v892_v48, 0.0  ;;  %v1273_v56 = vpop.f32.mrb[24].mxu0  ;;  %722 = vst.msk [vmem:[%s2292_s2 + $0x1b0] sm:$0xff] %vm667_vm1, %v1994_v7 }
 0x10c   :  { %v978_v57 = vadd.f32 %v977_v55, %v976_v52  ;;  %693 = vst.msk [vmem:[%s2292_s2 + $0xc8] sm:$0xff] %vm667_vm1, %v1273_v56  ;;  %v468_v59 = vpop.f32.mrb[25].mxu0  ;;  %v779_v61 = vadd.f32 %v778_v54, %v777_v51  ;;  %v895_v1 = vmul.f32 %v1273_v56, %v1273_v56  ;;  %v782_v8 = vsel %vm667_vm1, %v1273_v56, 0.0 }
 0x10d   :  { %692 = vst.msk [vmem:[%s2292_s2 + $0xc0] sm:$0xff] %vm667_vm1, %v468_v59  ;;  %v780_v2 = vsel %vm667_vm1, %v468_v59, 0.0  ;;  %v894_v3 = vmul.f32 %v468_v59, %v468_v59  ;;  %v2013_v24 = vpop.f32.mrb[24].mxu1 }
 0x10e   :  { %v781_v5 = vadd.f32 %v780_v2, %v779_v61  ;;  %v980_v6 = vadd.f32 %v979_v0, %v978_v57  ;;  %v983_v19 = vsel %vm667_vm1, %v895_v1, 0.0  ;;  %725 = vst.msk [vmem:[%s2292_s2 + $0x1c8] sm:$0xff] %vm667_vm1, %v2013_v24  ;;  %v2020_v28 = vpop.f32.mrb[25].mxu1  ;;  %v902_v0 = vmul.f32 %v1706_v20, %v1706_v20 }
 0x10f   :  { %v981_v9 = vsel %vm667_vm1, %v894_v3, 0.0  ;;  %v1276_v12 = vpop.f32.mrb[26].mxu0  ;;  %724 = vst.msk [vmem:[%s2292_s2 + $0x1c0] sm:$0xff] %vm667_vm1, %v2020_v28 }
 0x110   :  { %v982_v14 = vadd.f32 %v981_v9, %v980_v6  ;;  %695 = vst.msk [vmem:[%s2292_s2 + $0xd8] sm:$0xff] %vm667_vm1, %v1276_v12  ;;  %v478_v16 = vpop.f32.mrb[27].mxu0  ;;  %v783_v17 = vadd.f32 %v782_v8, %v781_v5  ;;  %v897_v21 = vmul.f32 %v1276_v12, %v1276_v12  ;;  %v786_v31 = vsel %vm667_vm1, %v1276_v12, 0.0 }
 0x111   :  { %694 = vst.msk [vmem:[%s2292_s2 + $0xd0] sm:$0xff] %vm667_vm1, %v478_v16  ;;  %v784_v22 = vsel %vm667_vm1, %v478_v16, 0.0  ;;  %v896_v23 = vmul.f32 %v478_v16, %v478_v16  ;;  %v2039_v47 = vpop.f32.mrb[26].mxu1 }
 0x112   :  { %v785_v25 = vadd.f32 %v784_v22, %v783_v17  ;;  %v984_v27 = vadd.f32 %v983_v19, %v982_v14  ;;  %v987_v40 = vsel %vm667_vm1, %v897_v21, 0.0  ;;  %727 = vst.msk [vmem:[%s2292_s2 + $0x1d8] sm:$0xff] %vm667_vm1, %v2039_v47  ;;  %v2046_v52 = vpop.f32.mrb[27].mxu1  ;;  %v796_v17 = vsel %vm667_vm1, %v1706_v20, 0.0 }
 0x113   :  { %v985_v33 = vsel %vm667_vm1, %v896_v23, 0.0  ;;  %v1279_v36 = vpop.f32.mrb[28].mxu0  ;;  %726 = vst.msk [vmem:[%s2292_s2 + $0x1d0] sm:$0xff] %vm667_vm1, %v2046_v52  ;;  %v903_v23 = vmul.f32 %v1699_v18, %v1699_v18 }
 0x114   :  { %v986_v37 = vadd.f32 %v985_v33, %v984_v27  ;;  %697 = vst.msk [vmem:[%s2292_s2 + $0xe8] sm:$0xff] %vm667_vm1, %v1279_v36  ;;  %v488_v38 = vpop.f32.mrb[29].mxu0  ;;  %v787_v39 = vadd.f32 %v786_v31, %v785_v25  ;;  %v899_v41 = vmul.f32 %v1279_v36, %v1279_v36  ;;  %v790_v54 = vsel %vm667_vm1, %v1279_v36, 0.0 }
 0x115   :  { %696 = vst.msk [vmem:[%s2292_s2 + $0xe0] sm:$0xff] %vm667_vm1, %v488_v38  ;;  %v788_v43 = vsel %vm667_vm1, %v488_v38, 0.0  ;;  %v898_v44 = vmul.f32 %v488_v38, %v488_v38  ;;  %v2067_v6 = vpop.f32.mrb[28].mxu1  ;;  %v997_v25 = vsel %vm667_vm1, %v902_v0, 0.0  ;;  %v904_v27 = vmul.f32 %v1734_v35, %v1734_v35 }
 0x116   :  { %v789_v48 = vadd.f32 %v788_v43, %v787_v39  ;;  %v988_v51 = vadd.f32 %v987_v40, %v986_v37  ;;  %v991_v1 = vsel %vm667_vm1, %v899_v41, 0.0  ;;  %729 = vst.msk [vmem:[%s2292_s2 + $0x1e8] sm:$0xff] %vm667_vm1, %v2067_v6  ;;  %v2074_v12 = vpop.f32.mrb[29].mxu1  ;;  %v798_v37 = vsel %vm667_vm1, %v1699_v18, 0.0 }
 0x117   :  { %v989_v55 = vsel %vm667_vm1, %v898_v44, 0.0  ;;  %v1282_v56 = vpop.f32.mrb[30].mxu0  ;;  %728 = vst.msk [vmem:[%s2292_s2 + $0x1e0] sm:$0xff] %vm667_vm1, %v2074_v12  ;;  %v800_v38 = vsel %vm667_vm1, %v1734_v35, 0.0  ;;  %v999_v41 = vsel %vm667_vm1, %v903_v23, 0.0  ;;  %v905_v43 = vmul.f32 %v1727_v32, %v1727_v32 }
 0x118   :  { %v990_v57 = vadd.f32 %v989_v55, %v988_v51  ;;  %699 = vst.msk [vmem:[%s2292_s2 + $0xf8] sm:$0xff] %vm667_vm1, %v1282_v56  ;;  %v498_v59 = vpop.f32.mrb[31].mxu0  ;;  %v791_v61 = vadd.f32 %v790_v54, %v789_v48  ;;  %v901_v2 = vmul.f32 %v1282_v56, %v1282_v56  ;;  %v794_v14 = vsel %vm667_vm1, %v1282_v56, 0.0 }
 0x119   :  { %698 = vst.msk [vmem:[%s2292_s2 + $0xf0] sm:$0xff] %vm667_vm1, %v498_v59  ;;  %v792_v3 = vsel %vm667_vm1, %v498_v59, 0.0  ;;  %v900_v5 = vmul.f32 %v498_v59, %v498_v59  ;;  %v2091_v31 = vpop.f32.mrb[30].mxu1  ;;  %v1001_v44 = vsel %vm667_vm1, %v904_v27, 0.0  ;;  %v906_v18 = vmul.f32 %v1760_v49, %v1760_v49 }
 0x11a   :  { %v793_v8 = vadd.f32 %v792_v3, %v791_v61  ;;  %v992_v9 = vadd.f32 %v991_v1, %v990_v57  ;;  %v995_v22 = vsel %vm667_vm1, %v901_v2, 0.0  ;;  %731 = vst.msk [vmem:[%s2292_s2 + $0x1f8] sm:$0xff] %vm667_vm1, %v2091_v31  ;;  %v2098_v36 = vpop.f32.mrb[31].mxu1  ;;  %v802_v51 = vsel %vm667_vm1, %v1727_v32, 0.0 }
 0x11b   :  { %v993_v16 = vsel %vm667_vm1, %v900_v5, 0.0  ;;  %730 = vst.msk [vmem:[%s2292_s2 + $0x1f0] sm:$0xff] %vm667_vm1, %v2098_v36  ;;  %v804_v54 = vsel %vm667_vm1, %v1760_v49, 0.0  ;;  %v1003_v57 = vsel %vm667_vm1, %v905_v43, 0.0  ;;  %v907_v59 = vmul.f32 %v1753_v46, %v1753_v46  ;;  %s1389_s2 = smov [#allocation2]  }
 0x11c   :  { %v795_v19 = vadd.f32 %v794_v14, %v793_v8  ;;  %v994_v21 = vadd.f32 %v993_v16, %v992_v9  ;;  %v1005_v61 = vsel %vm667_vm1, %v906_v18, 0.0  ;;  %v908_v0 = vmul.f32 %v1786_v63, %v1786_v63  ;;  %s1077_s26 = sshll.u32 %s1389_s2, 4  ;;  %s1078_s26 = int_to_ptr.vmem [resolvable:$true] %s1077_s26 }
 0x11d   :  { %v806_v32 = vsel %vm667_vm1, %v1753_v46, 0.0  ;;  %v808_v49 = vsel %vm667_vm1, %v1786_v63, 0.0  ;;  %v1007_v8 = vsel %vm667_vm1, %v907_v59, 0.0  ;;  %v909_v9 = vmul.f32 %v1779_v60, %v1779_v60  ;;  %s1340_s29 = scalar_lea.vmem %s1078_s26, 16  ;;  %s1344_s30 = scalar_lea.vmem %s1078_s26, 32 }
 0x11e   :  { %v996_v20 = vadd.f32 %v995_v22, %v994_v21  ;;  %v797_v33 = vadd.f32 %v796_v17, %v795_v19  ;;  %v1009_v14 = vsel %vm667_vm1, %v908_v0, 0.0  ;;  %v910_v16 = vmul.f32 %v1812_v13, %v1812_v13  ;;  %p1341_p0 = scmp.ne.s32.totalorder %s1078_s26, %s1340_s29  ;;  %p1345_p1 = scmp.lt.s32.totalorder %s1078_s26, %s1078_s26 }
 0x11f   :  { %v810_v46 = vsel %vm667_vm1, %v1779_v60, 0.0  ;;  %v812_v63 = vsel %vm667_vm1, %v1812_v13, 0.0  ;;  %v1011_v23 = vsel %vm667_vm1, %v909_v9, 0.0  ;;  %v814_v60 = vsel %vm667_vm1, %v1805_v10, 0.0  ;;  %p1346_p2 = scmp.lt.s32.totalorder %s1344_s30, %s1340_s29 }
 0x120   :  { %v998_v39 = vadd.f32 %v997_v25, %v996_v20  ;;  %v799_v40 = vadd.f32 %v798_v37, %v797_v33  ;;  %v911_v25 = vmul.f32 %v1805_v10, %v1805_v10  ;;  %v1013_v27 = vsel %vm667_vm1, %v910_v16, 0.0 }
 0x121   :  { %v912_v20 = vmul.f32 %v1838_v29, %v1838_v29  ;;  %v816_v13 = vsel %vm667_vm1, %v1838_v29, 0.0  ;;  %v818_v10 = vsel %vm667_vm1, %v1831_v26, 0.0  ;;  %v820_v29 = vsel %vm667_vm1, %v1864_v45, 0.0  ;;  %p1347_p3 = por %p1346_p2, %p1345_p1 }
 0x122   :  { %v801_v48 = vadd.f32 %v800_v38, %v799_v40  ;;  %v1000_v35 = vadd.f32 %v999_v41, %v998_v39  ;;  %v1015_v40 = vsel %vm667_vm1, %v911_v25, 0.0  ;;  %v913_v41 = vmul.f32 %v1831_v26, %v1831_v26 }
 0x123   :  { %v1017_v43 = vsel %vm667_vm1, %v912_v20, 0.0  ;;  %v822_v26 = vsel %vm667_vm1, %v1857_v42, 0.0  ;;  %p1348_p4 = pnand %p1347_p3, %p1341_p0 }
 0x124   :  { %v1002_v55 = vadd.f32 %v1001_v44, %v1000_v35  ;;  %v803_v56 = vadd.f32 %v802_v51, %v801_v48  ;;  %v914_v44 = vmul.f32 %v1864_v45, %v1864_v45  ;;  %v824_v45 = vsel %vm667_vm1, %v1890_v62, 0.0 }
 0x126   :  { %v805_v1 = vadd.f32 %v804_v54, %v803_v56  ;;  %v1004_v2 = vadd.f32 %v1003_v57, %v1002_v55  ;;  %v1019_v54 = vsel %vm667_vm1, %v913_v41, 0.0  ;;  %v915_v55 = vmul.f32 %v1857_v42, %v1857_v42 }
 0x127   :  { %v1021_v56 = vsel %vm667_vm1, %v914_v44, 0.0  ;;  %v916_v57 = vmul.f32 %v1890_v62, %v1890_v62  ;;  %v826_v42 = vsel %vm667_vm1, %v1883_v58, 0.0  ;;  %v828_v62 = vsel %vm667_vm1, %v1916_v15, 0.0 }
 0x128   :  { %v1006_v3 = vadd.f32 %v1005_v61, %v1004_v2  ;;  %v807_v5 = vadd.f32 %v806_v32, %v805_v1  ;;  %v1023_v2 = vsel %vm667_vm1, %v915_v55, 0.0  ;;  %v917_v32 = vmul.f32 %v1883_v58, %v1883_v58 }
 0x129   :  { %v830_v58 = vsel %vm667_vm1, %v1909_v11, 0.0 }
 0x12a   :  { %v809_v17 = vadd.f32 %v808_v49, %v807_v5  ;;  %v1008_v19 = vadd.f32 %v1007_v8, %v1006_v3  ;;  %v1025_v49 = vsel %vm667_vm1, %v916_v57, 0.0  ;;  %v918_v3 = vmul.f32 %v1916_v15, %v1916_v15 }
 0x12b   :  { %v1027_v16 = vsel %vm667_vm1, %v917_v32, 0.0  ;;  %v832_v15 = vsel %vm667_vm1, %v1942_v34, 0.0 }
 0x12c   :  { %v1010_v21 = vadd.f32 %v1009_v14, %v1008_v19  ;;  %v811_v22 = vadd.f32 %v810_v46, %v809_v17  ;;  %v919_v17 = vmul.f32 %v1909_v11, %v1909_v11  ;;  %v1029_v19 = vsel %vm667_vm1, %v918_v3, 0.0 }
 0x12d   :  { %v920_v46 = vmul.f32 %v1942_v34, %v1942_v34  ;;  %v834_v11 = vsel %vm667_vm1, %v1935_v30, 0.0  ;;  %v836_v34 = vsel %vm667_vm1, %v1968_v53, 0.0 }
 0x12e   :  { %v813_v33 = vadd.f32 %v812_v63, %v811_v22  ;;  %v1012_v37 = vadd.f32 %v1011_v23, %v1010_v21  ;;  %v1031_v25 = vsel %vm667_vm1, %v919_v17, 0.0 }
 0x12f   :  { %v1033_v20 = vsel %vm667_vm1, %v920_v46, 0.0 }
 0x130   :  { %v1014_v38 = vadd.f32 %v1013_v27, %v1012_v37  ;;  %v815_v39 = vadd.f32 %v814_v60, %v813_v33  ;;  %v921_v27 = vmul.f32 %v1935_v30, %v1935_v30  ;;  %v922_v33 = vmul.f32 %v1968_v53, %v1968_v53 }
 0x131   :  { %v838_v30 = vsel %vm667_vm1, %v1961_v50, 0.0  ;;  %v840_v53 = vsel %vm667_vm1, %v1994_v7, 0.0 }
 0x132   :  { %v817_v18 = vadd.f32 %v816_v13, %v815_v39  ;;  %v1016_v48 = vadd.f32 %v1015_v40, %v1014_v38  ;;  %v1035_v39 = vsel %vm667_vm1, %v921_v27, 0.0  ;;  %v923_v40 = vmul.f32 %v1961_v50, %v1961_v50 }
 0x133   :  { %v1037_v41 = vsel %vm667_vm1, %v922_v33, 0.0  ;;  %v842_v50 = vsel %vm667_vm1, %v1987_v4, 0.0 }
 0x134   :  { %v1018_v35 = vadd.f32 %v1017_v43, %v1016_v48  ;;  %v819_v51 = vadd.f32 %v818_v10, %v817_v18  ;;  %v924_v43 = vmul.f32 %v1994_v7, %v1994_v7  ;;  %v844_v7 = vsel %vm667_vm1, %v2020_v28, 0.0 }
 0x136   :  { %v821_v59 = vadd.f32 %v820_v29, %v819_v51  ;;  %v1020_v61 = vadd.f32 %v1019_v54, %v1018_v35  ;;  %v1039_v29 = vsel %vm667_vm1, %v923_v40, 0.0  ;;  %v925_v35 = vmul.f32 %v1987_v4, %v1987_v4 }
 0x137   :  { %v1041_v51 = vsel %vm667_vm1, %v924_v43, 0.0  ;;  %v926_v54 = vmul.f32 %v2020_v28, %v2020_v28  ;;  %v846_v4 = vsel %vm667_vm1, %v2013_v24, 0.0  ;;  %v848_v28 = vsel %vm667_vm1, %v2046_v52, 0.0 }
 0x138   :  { %v1022_v0 = vadd.f32 %v1021_v56, %v1020_v61  ;;  %v823_v1 = vadd.f32 %v822_v26, %v821_v59  ;;  %v1043_v61 = vsel %vm667_vm1, %v925_v35, 0.0  ;;  %v927_v26 = vmul.f32 %v2013_v24, %v2013_v24 }
 0x139   :  { %v850_v24 = vsel %vm667_vm1, %v2039_v47, 0.0 }
 0x13a   :  { %v825_v5 = vadd.f32 %v824_v45, %v823_v1  ;;  %v1024_v8 = vadd.f32 %v1023_v2, %v1022_v0  ;;  %v1045_v45 = vsel %vm667_vm1, %v926_v54, 0.0  ;;  %v928_v0 = vmul.f32 %v2046_v52, %v2046_v52 }
 0x13b   :  { %v1047_v3 = vsel %vm667_vm1, %v927_v26, 0.0  ;;  %v852_v52 = vsel %vm667_vm1, %v2074_v12, 0.0 }
 0x13c   :  { %v1026_v9 = vadd.f32 %v1025_v49, %v1024_v8  ;;  %v827_v14 = vadd.f32 %v826_v42, %v825_v5  ;;  %v929_v5 = vmul.f32 %v2039_v47, %v2039_v47  ;;  %v1049_v8 = vsel %vm667_vm1, %v928_v0, 0.0 }
 0x13d   :  { %v930_v42 = vmul.f32 %v2074_v12, %v2074_v12  ;;  %v854_v47 = vsel %vm667_vm1, %v2067_v6, 0.0  ;;  %v856_v12 = vsel %vm667_vm1, %v2098_v36, 0.0 }
 0x13e   :  { %v829_v63 = vadd.f32 %v828_v62, %v827_v14  ;;  %v1028_v21 = vadd.f32 %v1027_v16, %v1026_v9  ;;  %v1051_v17 = vsel %vm667_vm1, %v929_v5, 0.0 }
 0x13f   :  { %v1053_v46 = vsel %vm667_vm1, %v930_v42, 0.0 }
 0x140   :  { %v1030_v22 = vadd.f32 %v1029_v19, %v1028_v21  ;;  %v831_v23 = vadd.f32 %v830_v58, %v829_v63  ;;  %v931_v19 = vmul.f32 %v2067_v6, %v2067_v6  ;;  %v932_v63 = vmul.f32 %v2098_v36, %v2098_v36 }
 0x142   :  { %v833_v37 = vadd.f32 %v832_v15, %v831_v23  ;;  %v1032_v60 = vadd.f32 %v1031_v25, %v1030_v22  ;;  %v1055_v23 = vsel %vm667_vm1, %v931_v19, 0.0  ;;  %v933_v25 = vmul.f32 %v2091_v31, %v2091_v31 }
 0x143   :  { %v1057_v27 = vsel %vm667_vm1, %v932_v63, 0.0 }
 0x144   :  { %v1034_v13 = vadd.f32 %v1033_v20, %v1032_v60  ;;  %v835_v38 = vadd.f32 %v834_v11, %v833_v37  ;;  %v858_v37 = vsel %vm667_vm1, %v2091_v31, 0.0  ;;  %v1059_v6 = vsel %vm667_vm1, %v933_v25, 0.0  ;;  %v869_v31 = vld [vmem:[#allocation4] sm:$0x1] }
 0x146   :  { %v837_v44 = vadd.f32 %v836_v34, %v835_v38  ;;  %v1036_v18 = vadd.f32 %v1035_v39, %v1034_v13 }
 0x148   :  { %v1038_v48 = vadd.f32 %v1037_v41, %v1036_v18  ;;  %v839_v10 = vadd.f32 %v838_v30, %v837_v44  ;;  %v732_v30 = vld [vmem:[#allocation2] sm:$0x1] }
 0x14a   :  { %v841_v55 = vadd.f32 %v840_v53, %v839_v10  ;;  %v1040_v56 = vadd.f32 %v1039_v29, %v1038_v48 }
 0x14c   :  { %v1042_v57 = vadd.f32 %v1041_v51, %v1040_v56  ;;  %v843_v59 = vadd.f32 %v842_v50, %v841_v55 }
 0x14e   :  { %v845_v1 = vadd.f32 %v844_v7, %v843_v59  ;;  %v1044_v2 = vadd.f32 %v1043_v61, %v1042_v57 }
 0x150   :  { %v1046_v32 = vadd.f32 %v1045_v45, %v1044_v2  ;;  %v847_v49 = vadd.f32 %v846_v4, %v845_v1 }
 0x152   :  { %v849_v62 = vadd.f32 %v848_v28, %v847_v49  ;;  %v1048_v9 = vadd.f32 %v1047_v3, %v1046_v32 }
 0x154   :  { %v1050_v14 = vadd.f32 %v1049_v8, %v1048_v9  ;;  %v851_v16 = vadd.f32 %v850_v24, %v849_v62 }
 0x156   :  { %v853_v21 = vadd.f32 %v852_v52, %v851_v16  ;;  %v1052_v58 = vadd.f32 %v1051_v17, %v1050_v14 }
 0x158   :  { %v1054_v15 = vadd.f32 %v1053_v46, %v1052_v58  ;;  %v855_v22 = vadd.f32 %v854_v47, %v853_v21 }
 0x15a   :  { %v857_v20 = vadd.f32 %v856_v12, %v855_v22  ;;  %v1056_v33 = vadd.f32 %v1055_v23, %v1054_v15 }
 0x15c   :  { %v859_v60 = vadd.f32 %v858_v37, %v857_v20  ;;  %v1058_v11 = vadd.f32 %v1057_v27, %v1056_v33 }
 0x15e   :  { %v860_v34 = vrot.slane %v859_v60, 4  ;;  %v1060_v36 = vadd.f32 %v1059_v6, %v1058_v11 }
 0x160   :  { %v861_v13 = vadd.f32 %v860_v34, %v859_v60  ;;  %v1061_v38 = vrot.slane %v1060_v36, 4 }
 0x162   :  { %v862_v39 = vrot.slane %v861_v13, 2  ;;  %v1062_v40 = vadd.f32 %v1061_v38, %v1060_v36 }
 0x164   :  { %v863_v41 = vadd.f32 %v862_v39, %v861_v13  ;;  %v1063_v43 = vrot.slane %v1062_v40, 2 }
 0x166   :  { %v864_v44 = vrot.slane %v863_v41, 1  ;;  %v1064_v18 = vadd.f32 %v1063_v43, %v1062_v40 }
 0x168   :  { %v865_v53 = vadd.f32 %v864_v44, %v863_v41  ;;  %v1065_v48 = vrot.slane %v1064_v18, 1 }
 0x16a   :  { %v866_v10 = vadd.f32 %v865_v53, %v732_v30  ;;  %v1066_v29 = vadd.f32 %v1065_v48, %v1064_v18 }
 0x16c   :  { %868 = vst.msk [vmem:[#allocation2] sm:$0x1] %vm20_vm2, %v866_v10  ;;  %v1067_v35 = vadd.f32 %v1066_v29, %v869_v31 }
 0x16d   :  { %1351 = shalt.err (!%p1348_p4)
}
 0x16e   :  { %s1352_s7 = scalar_lea.hbm %s2293_s3, 16 }
 0x16f   :  { %p1353_p5 = scmp.ne.s32.totalorder %s2293_s3, %s1352_s7  ;;  %p1356_p6 = scmp.lt.u32.totalorder %s1352_s7, %s2293_s3 }
 0x171   :  { %p1358_p7 = pnand %p1356_p6, %p1353_p5 }
 0x173   :  { %1361 = shalt.err (!%p1358_p7)
}
 0x174   :  { %1080 = dma.vmem_to_hbm [thread:$0]  %s1078_s26, 16, %s2293_s3, [#allocation3]   ;;  %1068 = vst.msk [vmem:[#allocation4] sm:$0x1] %vm20_vm2, %v1067_v35 }
 0x175   :  { %s1362_s14 = scalar_lea.vmem %s2257_s28, 16  ;;  %s1366_s15 = scalar_lea.vmem %s2257_s28, 32 }
 0x176   :  { %p1363_p8 = scmp.ne.s32.totalorder %s2257_s28, %s1362_s14  ;;  %p1367_p9 = scmp.lt.s32.totalorder %s2257_s28, %s2257_s28 }
 0x177   :  { %p1368_p10 = scmp.lt.s32.totalorder %s1366_s15, %s1362_s14 }
 0x179   :  { %p1369_p11 = por %p1368_p10, %p1367_p9 }
 0x17b   :  { %p1370_p12 = pnand %p1369_p11, %p1363_p8 }
 0x17d   :  { %1373 = shalt.err (!%p1370_p12)
}
 0x17e   :  { %s1374_s17 = scalar_lea.hbm %s2294_s4, 16 }
 0x17f   :  { %p1375_p13 = scmp.ne.s32.totalorder %s2294_s4, %s1374_s17  ;;  %p1378_p0 = scmp.lt.u32.totalorder %s1374_s17, %s2294_s4 }
 0x181   :  { %p1380_p1 = pnand %p1378_p0, %p1375_p13 }
 0x183   :  { %1383 = shalt.err (!%p1380_p1)
}
 0x184   :  { %1090 = dma.vmem_to_hbm [thread:$0]  %s2257_s28, 16, %s2294_s4, [#allocation5]  }
 0x185   :  { %1384 = dma.done.wait [#allocation3], 16  }
 0x186   :  { %1385 = vsyncadd [#allocation3], 4294967280 }
 0x187   :  { %1386 = dma.done.wait [#allocation5], 16  }
 0x188   :  { %1387 = vsyncadd [#allocation5], 4294967280 }
 0x189   :  { %1099 = vsyncpa [#allocation3], 1 }
 0x18a   :  { %1100 = vsyncpa [#allocation5], 1 }

</bundles_post_ra>
